<compile_context>
chip_gen: v5e
topology: v5e:2x2
jax: 0.10.0
libtpu: 0.0.40
codegen_flags: <defaults>
</compile_context>

<pallas_src>
import math
from functools import partial

import jax
import jax.numpy as jnp
from jax.experimental import pallas as pl
from jax.experimental.pallas import tpu as pltpu


EXPANSION = 4  # Bottleneck.expansion
_VMEM_BUDGET = 20 * 1024 * 1024          # resident-B working-set budget (v7x safe)
_VMEM_LIMIT = 32 * 1024 * 1024           # scoped VMEM limit for GEMM pallas_calls


def _round_up(x, m):
    return ((x + m - 1) // m) * m


def _kp(K):
    """Padded reduction size for the GEMM weight layout."""
    if K <= 1024:
        return _round_up(max(K, 16), 16)
    return _round_up(K, 128)


# --------------------------------------------------------------------------
# Pallas GEMM kernels (bf16 MXU operands, f32 math in the epilogue).
# st_ref packs [scale; shift] as a (2, Np) block.
# --------------------------------------------------------------------------
def _mm_single_kernel(a_ref, b_ref, st_ref, o_ref, *, relu):
    acc = jnp.dot(a_ref[...], b_ref[...], preferred_element_type=jnp.float32)
    out = acc * st_ref[0:1, :] + st_ref[1:2, :]
    if relu:
        out = jnp.maximum(out, 0.0)
    o_ref[...] = out.astype(o_ref.dtype)


def _mm_single_res_kernel(a_ref, b_ref, st_ref, r_ref, o_ref, *, relu):
    acc = jnp.dot(a_ref[...], b_ref[...], preferred_element_type=jnp.float32)
    out = acc * st_ref[0:1, :] + st_ref[1:2, :] + r_ref[...].astype(jnp.float32)
    if relu:
        out = jnp.maximum(out, 0.0)
    o_ref[...] = out.astype(o_ref.dtype)


def _mm_acc_kernel(a_ref, b_ref, st_ref, o_ref, acc_ref, *, relu):
    # K-tiled fallback: overwrite on k == 0 (no zero-fill), accumulate otherwise.
    @pl.when(pl.program_id(2) == 0)
    def _():
        acc_ref[...] = jnp.dot(a_ref[...], b_ref[...],
                               preferred_element_type=jnp.float32)

    @pl.when(pl.program_id(2) != 0)
    def _():
        acc_ref[...] += jnp.dot(a_ref[...], b_ref[...],
                                preferred_element_type=jnp.float32)

    @pl.when(pl.program_id(2) == pl.num_programs(2) - 1)
    def _():
        out = acc_ref[...] * st_ref[0:1, :] + st_ref[1:2, :]
        if relu:
            out = jnp.maximum(out, 0.0)
        o_ref[...] = out.astype(o_ref.dtype)


def _mm_acc_res_kernel(a_ref, b_ref, st_ref, r_ref, o_ref, acc_ref, *, relu):
    @pl.when(pl.program_id(2) == 0)
    def _():
        acc_ref[...] = jnp.dot(a_ref[...], b_ref[...],
                               preferred_element_type=jnp.float32)

    @pl.when(pl.program_id(2) != 0)
    def _():
        acc_ref[...] += jnp.dot(a_ref[...], b_ref[...],
                                preferred_element_type=jnp.float32)

    @pl.when(pl.program_id(2) == pl.num_programs(2) - 1)
    def _():
        out = (acc_ref[...] * st_ref[0:1, :] + st_ref[1:2, :]
               + r_ref[...].astype(jnp.float32))
        if relu:
            out = jnp.maximum(out, 0.0)
        o_ref[...] = out.astype(o_ref.dtype)


def _matmul_fused(A, Bp, STp, residual, *, relu, oc, out_dtype):
    """A:(M,K), Bp:(Kp,Np) bf16 pre-padded, STp:(2,Np) f32 [scale;shift],
    residual:(M,oc) or None.  Returns (M,oc) in out_dtype."""
    M, K = A.shape
    Kp, Np = Bp.shape

    Mp8 = _round_up(max(M, 8), 8)
    TM = Mp8 if Mp8 <= 256 else 256
    Mp = _round_up(max(M, TM), TM)

    A = A.astype(jnp.bfloat16)
    if (Mp, Kp) != (M, K):
        A = jnp.pad(A, ((0, Mp - M), (0, Kp - K)))

    has_res = residual is not None
    if has_res:
        R = residual.astype(jnp.bfloat16)
        if R.shape != (Mp, Np):
            R = jnp.pad(R, ((0, Mp - R.shape[0]), (0, Np - R.shape[1])))

    out_bytes = jnp.dtype(out_dtype).itemsize
    # Conservative double-buffered working-set estimate for the resident-B path.
    resident_bytes = (2 * Kp * Np * 2            # B (bf16)
                      + 2 * TM * Kp * 2          # A tiles (bf16)
                      + 2 * 2 * Np * 4           # scale/shift
                      + 2 * TM * Np * out_bytes  # output tiles
                      + (2 * TM * Np * 2 if has_res else 0))

    if resident_bytes <= _VMEM_BUDGET:
        # Resident weight, single K step, 1-D grid over M.
        in_specs = [
            pl.BlockSpec((TM, Kp), lambda i: (i, 0)),
            pl.BlockSpec((Kp, Np), lambda i: (0, 0)),   # resident weight block
            pl.BlockSpec((2, Np), lambda i: (0, 0)),
        ]
        args = [A, Bp, STp]
        if has_res:
            in_specs.append(pl.BlockSpec((TM, Np), lambda i: (i, 0)))
            args.append(R)
            kernel = partial(_mm_single_res_kernel, relu=relu)
        else:
            kernel = partial(_mm_single_kernel, relu=relu)

        out = pl.pallas_call(
            kernel,
            out_shape=jax.ShapeDtypeStruct((Mp, Np), out_dtype),
            grid_spec=pltpu.PrefetchScalarGridSpec(
                num_scalar_prefetch=0,
                grid=(Mp // TM,),
                in_specs=in_specs,
                out_specs=pl.BlockSpec((TM, Np), lambda i: (i, 0)),
            ),
            compiler_params=pltpu.CompilerParams(
                dimension_semantics=("parallel",),
                vmem_limit_bytes=_VMEM_LIMIT,
            ),
        )(*args)
    else:
        # K/N tiled fallback with an f32 VMEM accumulator.
        TN = 256 if Np % 256 == 0 else 128
        if Kp % 128 == 0:
            TK = 128
            for cand in range(128, 2049, 128):
                if Kp % cand == 0:
                    TK = cand
        else:
            TK = Kp
        in_specs = [
            pl.BlockSpec((TM, TK), lambda i, j, k: (i, k)),
            pl.BlockSpec((TK, TN), lambda i, j, k: (k, j)),
            pl.BlockSpec((2, TN), lambda i, j, k: (0, j)),
        ]
        args = [A, Bp, STp]
        if has_res:
            in_specs.append(pl.BlockSpec((TM, TN), lambda i, j, k: (i, j)))
            args.append(R)
            kernel = partial(_mm_acc_res_kernel, relu=relu)
        else:
            kernel = partial(_mm_acc_kernel, relu=relu)

        out = pl.pallas_call(
            kernel,
            out_shape=jax.ShapeDtypeStruct((Mp, Np), out_dtype),
            grid_spec=pltpu.PrefetchScalarGridSpec(
                num_scalar_prefetch=0,
                grid=(Mp // TM, Np // TN, Kp // TK),
                in_specs=in_specs,
                out_specs=pl.BlockSpec((TM, TN), lambda i, j, k: (i, j)),
                scratch_shapes=[pltpu.VMEM((TM, TN), jnp.float32)],
            ),
            compiler_params=pltpu.CompilerParams(
                dimension_semantics=("parallel", "parallel", "arbitrary"),
                vmem_limit_bytes=_VMEM_LIMIT,
            ),
        )(*args)

    if (Mp, Np) != (M, oc):
        out = out[:M, :oc]
    return out


# --------------------------------------------------------------------------
# Convolution = (1x1 reshape | bf16 im2col glue) + fused Pallas GEMM
# --------------------------------------------------------------------------
def _im2col(x, kh, kw, stride, padding, relu_input=False):
    """bf16 patch matrix (N*OH*OW, kh*kw*C). Optional fused input ReLU."""
    x = x.astype(jnp.bfloat16)
    if relu_input:
        x = jnp.maximum(x, 0)
    N, H, W, C = x.shape
    OH = (H + 2 * padding - kh) // stride + 1
    OW = (W + 2 * padding - kw) // stride + 1
    if padding:
        x = jnp.pad(x, ((0, 0), (padding, padding), (padding, padding), (0, 0)))
    if kh == 1 and kw == 1:
        xs = x[:, ::stride, ::stride, :] if stride > 1 else x
        patches = xs.reshape(N * OH * OW, C)
    else:
        cols = [x[:, i:i + stride * OH:stride, j:j + stride * OW:stride, :]
                for i in range(kh) for j in range(kw)]
        patches = jnp.concatenate(cols, axis=-1).reshape(N * OH * OW, kh * kw * C)
    return patches, OH, OW


@partial(jax.jit, static_argnames=("kh", "kw", "oc", "stride", "padding",
                                   "relu", "relu_input", "out_f32"))
def conv_gemm(x, Bp, STp, residual, *, kh, kw, oc, stride, padding,
              relu, relu_input, out_f32):
    N = x.shape[0]
    patches, OH, OW = _im2col(x, kh, kw, stride, padding, relu_input=relu_input)
    res2d = None if residual is None else residual.reshape(N * OH * OW, oc)
    out_dtype = jnp.float32 if out_f32 else jnp.bfloat16
    out = _matmul_fused(patches, Bp, STp, res2d, relu=relu, oc=oc,
                        out_dtype=out_dtype)
    return out.reshape(N, OH, OW, oc)


def apply_conv(x, pack, *, stride=1, padding=0, relu=False, residual=None,
               relu_input=False, out_f32=False):
    return conv_gemm(x, pack["B"], pack["st"], residual,
                     kh=pack["kh"], kw=pack["kw"], oc=pack["oc"],
                     stride=stride, padding=padding, relu=relu,
                     relu_input=relu_input, out_f32=out_f32)


@partial(jax.jit, static_argnames=("oc", "relu", "out_f32"))
def _mlconv_gemm(feats, Bp, STp, *, oc, relu, out_f32):
    """Shared-weight 3x3/pad1 conv applied to several feature maps via ONE GEMM
    over the concatenated patch matrices (merged reg/cls head layers)."""
    patches, shapes = [], []
    for f in feats:
        p, OH, OW = _im2col(f, 3, 3, 1, 1)
        patches.append(p)
        shapes.append((f.shape[0], OH, OW))
    big = jnp.concatenate(patches, axis=0)
    out_dtype = jnp.float32 if out_f32 else jnp.bfloat16
    out = _matmul_fused(big, Bp, STp, None, relu=relu, oc=oc, out_dtype=out_dtype)
    outs, off = [], 0
    for (N, OH, OW) in shapes:
        m = N * OH * OW
        outs.append(out[off:off + m].reshape(N, OH, OW, oc))
        off += m
    return tuple(outs)


# --------------------------------------------------------------------------
# Stem max-pool: kh fold in XLA, kw fold in a tiled Pallas max3 kernel (bf16).
# --------------------------------------------------------------------------
def _max3_kernel(a_ref, b_ref, c_ref, o_ref):
    o_ref[...] = jnp.maximum(jnp.maximum(a_ref[...], b_ref[...]), c_ref[...])


def _row_tile(Mp, C, itemsize):
    step = 16
    cap = max(step, min(2048, ((1 << 20) // (itemsize * C)) // step * step))
    best = step
    for t in range(step, min(Mp, cap) + 1, step):
        if Mp % t == 0:
            best = t
    return best


def _eltwise_max3(a, b, c):
    shp = a.shape
    C = shp[-1]
    M = a.size // C
    Mp = _round_up(max(M, 16), 16)
    flats = []
    for arr in (a, b, c):
        f = arr.reshape(M, C)
        if Mp != M:
            f = jnp.pad(f, ((0, Mp - M), (0, 0)))
        flats.append(f)
    TMr = _row_tile(Mp, C, a.dtype.itemsize)
    out = pl.pallas_call(
        _max3_kernel,
        out_shape=jax.ShapeDtypeStruct((Mp, C), a.dtype),
        grid_spec=pltpu.PrefetchScalarGridSpec(
            num_scalar_prefetch=0,
            grid=(Mp // TMr,),
            in_specs=[pl.BlockSpec((TMr, C), lambda i: (i, 0)) for _ in range(3)],
            out_specs=pl.BlockSpec((TMr, C), lambda i: (i, 0)),
        ),
        compiler_params=pltpu.CompilerParams(dimension_semantics=("parallel",)),
    )(*flats)
    if Mp != M:
        out = out[:M]
    return out.reshape(shp)


@jax.jit
def maxpool2d_3x3_s2_p1(x):
    """MaxPool2d(kernel_size=3, stride=2, padding=1), NHWC, dtype-preserving."""
    N, H, W, C = x.shape
    OH = (H + 2 - 3) // 2 + 1
    OW = (W + 2 - 3) // 2 + 1
    neg = float(jnp.finfo(x.dtype).min)
    xp = jnp.pad(x, ((0, 0), (1, 1), (1, 1), (0, 0)), constant_values=neg)
    rowmax = jnp.maximum(jnp.maximum(xp[:, 0:2 * OH:2], xp[:, 1:1 + 2 * OH:2]),
                         xp[:, 2:2 + 2 * OH:2])
    c0 = rowmax[:, :, 0:2 * OW:2, :]
    c1 = rowmax[:, :, 1:1 + 2 * OW:2, :]
    c2 = rowmax[:, :, 2:2 + 2 * OW:2, :]
    return _eltwise_max3(c0, c1, c2)


def upsample_nearest_2x(x):
    # Plain-JAX glue (nearest-neighbor 2x), matches nn.Upsample(scale_factor=2).
    return jnp.repeat(jnp.repeat(x, 2, axis=1), 2, axis=2)


# --------------------------------------------------------------------------
# Deterministic parameter construction (weights pre-packed to GEMM layout)
# --------------------------------------------------------------------------
class ParamGen:
    def __init__(self, seed=0):
        self.key = jax.random.PRNGKey(seed)

    def conv(self, kh, kw, ic, oc):
        self.key, sub = jax.random.split(self.key)
        fan_in = kh * kw * ic
        return jax.random.normal(sub, (kh, kw, ic, oc), jnp.float32) / math.sqrt(fan_in)


def bn_params(c, eps=1e-5):
    gamma = jnp.ones((c,), jnp.float32)
    beta = jnp.zeros((c,), jnp.float32)
    mean = jnp.zeros((c,), jnp.float32)
    var = jnp.ones((c,), jnp.float32)
    s = gamma * jax.lax.rsqrt(var + eps)
    return s, beta - mean * s


def gemm_pack(w_hwio, scale, shift):
    """Pre-pad/cast a conv weight + per-channel affine to the GEMM kernel layout."""
    KH, KW, IC, OC = w_hwio.shape
    K = KH * KW * IC
    Kp = _kp(K)
    Np = _round_up(max(OC, 128), 128)
    Bm = w_hwio.reshape(K, OC).astype(jnp.bfloat16)
    Bp = jnp.zeros((Kp, Np), jnp.bfloat16).at[:K, :OC].set(Bm)
    ST = (jnp.zeros((2, Np), jnp.float32)
          .at[0, :OC].set(scale)
          .at[1, :OC].set(shift))
    return {"B": Bp, "st": ST, "kh": KH, "kw": KW, "oc": OC}


def build_params(num_classes, num_blocks=(3, 4, 6, 3), feature_size=256,
                 num_anchors=9, seed=0):
    g = ParamGen(seed)

    def conv_bn_pack(kh, kw, ic, oc):
        w = g.conv(kh, kw, ic, oc)
        s, t = bn_params(oc)
        return gemm_pack(w, s, t)

    def conv_bias_pack(kh, kw, ic, oc):
        w = g.conv(kh, kw, ic, oc)
        bias = jnp.zeros((oc,), jnp.float32)
        return gemm_pack(w, jnp.ones((oc,), jnp.float32), bias)

    p = {"stem": conv_bn_pack(7, 7, 3, 64)}

    in_planes = 64
    layers = []
    for planes, nb, stride in zip((64, 128, 256, 512), num_blocks, (1, 2, 2, 2)):
        blocks = []
        for s in [stride] + [1] * (nb - 1):
            blk = {
                "stride": s,
                "c1": conv_bn_pack(1, 1, in_planes, planes),
                "c2": conv_bn_pack(3, 3, planes, planes),
                "c3": conv_bn_pack(1, 1, planes, planes * EXPANSION),
            }
            if s != 1 or in_planes != planes * EXPANSION:
                blk["cd"] = conv_bn_pack(1, 1, in_planes, planes * EXPANSION)
            blocks.append(blk)
            in_planes = planes * EXPANSION
        layers.append(blocks)
    p["layers"] = layers

    C3, C4, C5 = 128 * EXPANSION, 256 * EXPANSION, 512 * EXPANSION  # 512,1024,2048
    fs = feature_size
    p["fpn"] = {
        "P5_1": conv_bias_pack(1, 1, C5, fs), "P5_2": conv_bias_pack(3, 3, fs, fs),
        "P4_1": conv_bias_pack(1, 1, C4, fs), "P4_2": conv_bias_pack(3, 3, fs, fs),
        "P3_1": conv_bias_pack(1, 1, C3, fs), "P3_2": conv_bias_pack(3, 3, fs, fs),
        "P6": conv_bias_pack(3, 3, C5, fs), "P7_2": conv_bias_pack(3, 3, fs, fs),
    }

    def head(out_ch):
        return {
            "conv1": conv_bias_pack(3, 3, fs, fs), "conv2": conv_bias_pack(3, 3, fs, fs),
            "conv3": conv_bias_pack(3, 3, fs, fs), "conv4": conv_bias_pack(3, 3, fs, fs),
            "out": conv_bias_pack(3, 3, fs, out_ch),
        }

    p["reg"] = head(num_anchors * 4)
    p["cls"] = head(num_anchors * num_classes)
    return p


# --------------------------------------------------------------------------
# Forward passes (mirror the PyTorch modules)
# --------------------------------------------------------------------------
def bottleneck_forward(x, blk):
    s = blk["stride"]
    out = apply_conv(x, blk["c1"], relu=True)
    out = apply_conv(out, blk["c2"], stride=s, padding=1, relu=True)
    if "cd" in blk:
        identity = apply_conv(x, blk["cd"], stride=s)
    else:
        identity = x
    # conv3 + BN + residual add + ReLU fused into one GEMM epilogue.
    return apply_conv(out, blk["c3"], residual=identity, relu=True)


def fpn_forward(fp, C3, C4, C5):
    P5 = apply_conv(C5, fp["P5_1"])
    P5_up = upsample_nearest_2x(P5)
    P5 = apply_conv(P5, fp["P5_2"], padding=1)
    P4 = apply_conv(C4, fp["P4_1"], residual=P5_up)    # lateral conv + add fused
    P4_up = upsample_nearest_2x(P4)
    P4 = apply_conv(P4, fp["P4_2"], padding=1)
    P3 = apply_conv(C3, fp["P3_1"], residual=P4_up)    # lateral conv + add fused
    P3 = apply_conv(P3, fp["P3_2"], padding=1)
    P6 = apply_conv(C5, fp["P6"], stride=2, padding=1)
    # P7_1 ReLU fused into P7_2's patch formation (no extra kernel / HBM round trip).
    P7 = apply_conv(P6, fp["P7_2"], stride=2, padding=1, relu_input=True)
    return [P3, P4, P5, P6, P7]


def head_forward(hp, features, last_dim):
    # Shared-weight head: one merged GEMM per conv layer across all 5 FPN levels.
    outs = tuple(features)
    for name in ("conv1", "conv2", "conv3", "conv4"):
        pk = hp[name]
        outs = _mlconv_gemm(outs, pk["B"], pk["st"], oc=pk["oc"],
                            relu=True, out_f32=False)
    pk = hp["out"]
    outs = _mlconv_gemm(outs, pk["B"], pk["st"], oc=pk["oc"],
                        relu=False, out_f32=True)
    # NHWC already matches the permute(0,2,3,1) layout.
    return [o.reshape(o.shape[0], -1, last_dim) for o in outs]


def resnet_forward(params, x_nchw, num_classes):
    # Input follows the PyTorch NCHW convention; convert to NHWC for the kernels.
    x = jnp.transpose(x_nchw, (0, 2, 3, 1))
    x = apply_conv(x, params["stem"], stride=2, padding=3, relu=True)
    x = maxpool2d_3x3_s2_p1(x)

    feats = []
    for blocks in params["layers"]:
        for blk in blocks:
            x = bottleneck_forward(x, blk)
        feats.append(x)
    _x1, x2, x3, x4 = feats

    features = fpn_forward(params["fpn"], x2, x3, x4)
    loc_preds = head_forward(params["reg"], features, 4)
    cls_preds = head_forward(params["cls"], features, num_classes)
    return loc_preds, cls_preds


# --------------------------------------------------------------------------
if __name__ == "__main__":
    num_classes = 8
    params = build_params(num_classes)

    key = jax.random.PRNGKey(0)
    x = jax.random.normal(key, (2, 3, 64, 64), jnp.float32)  # NCHW like PyTorch

    loc_preds, cls_preds = resnet_forward(params, x, num_classes)
    jax.block_until_ready((loc_preds, cls_preds))

    # basic shape sanity (5 FPN levels, 9 anchors per position)
    assert len(loc_preds) == 5 and len(cls_preds) == 5
    assert loc_preds[0].shape == (2, 8 * 8 * 9, 4)
    assert cls_preds[0].shape == (2, 8 * 8 * 9, num_classes)
    print("KERNEL_OK")
</pallas_src>

<mosaic_0001>
module attributes {stable_mosaic.version = 11 : i64} {
  func.func @_mm_single_kernel(%arg0: i32, %arg1: memref<256x160xbf16, #tpu.memory_space<vmem>>, %arg2: memref<160x128xbf16, #tpu.memory_space<vmem>>, %arg3: memref<2x128xf32, #tpu.memory_space<vmem>>, %arg4: memref<256x128xbf16, #tpu.memory_space<vmem>>) attributes {dimension_semantics = [#tpu.dimension_semantics<parallel>], iteration_bounds = array<i64: 8>, scalar_prefetch = 0 : i64, scratch_operands = 0 : i64, tpu.core_type = #tpu.core_type<tc>, window_params = [{transform_indices = @transform_0, window_bounds = array<i64: 256, 160>}, {pipeline_mode = #tpu.pipeline_mode<synchronous>, transform_indices = @transform_1, window_bounds = array<i64: 160, 128>}, {pipeline_mode = #tpu.pipeline_mode<synchronous>, transform_indices = @transform_2, window_bounds = array<i64: 2, 128>}, {transform_indices = @transform_3, window_bounds = array<i64: 256, 128>}]} {
    %c0 = arith.constant 0 : index
    %c0_0 = arith.constant 0 : index
    %0 = vector.load %arg1[%c0, %c0_0] : memref<256x160xbf16, #tpu.memory_space<vmem>>, vector<256x160xbf16>
    %c0_1 = arith.constant 0 : index
    %c0_2 = arith.constant 0 : index
    %1 = vector.load %arg2[%c0_1, %c0_2] : memref<160x128xbf16, #tpu.memory_space<vmem>>, vector<160x128xbf16>
    %cst = arith.constant dense<0.000000e+00> : vector<256x128xf32>
    %2 = tpu.matmul %0, %1, %cst {dimension_numbers = #tpu.dot_dimension_numbers<[1], [0], [0], [1], [0, 0, 1, 1], [], []>} : vector<256x160xbf16>, vector<160x128xbf16>, vector<256x128xf32> -> vector<256x128xf32>
    %c0_3 = arith.constant 0 : index
    %c0_4 = arith.constant 0 : index
    %3 = vector.load %arg3[%c0_3, %c0_4] : memref<2x128xf32, #tpu.memory_space<vmem>>, vector<1x128xf32>
    %4 = vector.broadcast %3 : vector<1x128xf32> to vector<256x128xf32>
    %5 = arith.mulf %2, %4 : vector<256x128xf32>
    %c1 = arith.constant 1 : index
    %c0_5 = arith.constant 0 : index
    %6 = vector.load %arg3[%c1, %c0_5] : memref<2x128xf32, #tpu.memory_space<vmem>>, vector<1x128xf32>
    %7 = vector.broadcast %6 : vector<1x128xf32> to vector<256x128xf32>
    %8 = arith.addf %5, %7 : vector<256x128xf32>
    %cst_6 = arith.constant 0.000000e+00 : f32
    %9 = vector.broadcast %cst_6 : f32 to vector<256x128xf32>
    %10 = arith.maximumf %8, %9 : vector<256x128xf32>
    %11 = arith.truncf %10 : vector<256x128xf32> to vector<256x128xbf16>
    %c0_7 = arith.constant 0 : index
    %c0_8 = arith.constant 0 : index
    %12 = vector.load %arg4[%c0_7, %c0_8] : memref<256x128xbf16, #tpu.memory_space<vmem>>, vector<256x128xbf16>
    tpu.vector_store %arg4[%c0_7, %c0_8], %11 {strides = array<i32>} : memref<256x128xbf16, #tpu.memory_space<vmem>>, vector<256x128xbf16>,
    return
  }
  func.func @transform_0(%arg0: i32) -> (i32, i32) {
    %c0_i32 = arith.constant 0 : i32
    %c0_i32_0 = arith.constant 0 : i32
    return %arg0, %c0_i32 : i32, i32
  }
  func.func @transform_1(%arg0: i32) -> (i32, i32) {
    %c0_i32 = arith.constant 0 : i32
    %c0_i32_0 = arith.constant 0 : i32
    %c0_i32_1 = arith.constant 0 : i32
    return %c0_i32, %c0_i32_0 : i32, i32
  }
  func.func @transform_2(%arg0: i32) -> (i32, i32) {
    %c0_i32 = arith.constant 0 : i32
    %c0_i32_0 = arith.constant 0 : i32
    %c0_i32_1 = arith.constant 0 : i32
    return %c0_i32, %c0_i32_0 : i32, i32
  }
  func.func @transform_3(%arg0: i32) -> (i32, i32) {
    %c0_i32 = arith.constant 0 : i32
    %c0_i32_0 = arith.constant 0 : i32
    return %arg0, %c0_i32 : i32, i32
  }
}

</mosaic_0001>

<bundles_post_ra>
// kernel: conv_gemm.1
= control target key start
LH: loop header
LB: loop body
LE: loop exit
PB: predicated region body
PF: predicated region fallthrough
CT: control target
= control target key end

     0   :  { %8 = vsyncpa [#allocation3], 0  ;;  %s1675_s0 = inlined_call_operand.vmem [shape: bf16[2048,160], index: 0, kind: input, shape index: {}]   ;;  %s1676_s1 = inlined_call_operand.vmem [shape: bf16[160,128], index: 1, kind: input, shape index: {}]   ;;  %s1677_s2 = inlined_call_operand.vmem [shape: f32[2,128], index: 2, kind: input, shape index: {}]   ;;  %s1678_s3 = inlined_call_operand.hbm [shape: bf16[2048,128], index: 3, kind: output, shape index: {}]  }
   0x1   :  { %10 = vsyncpa [#allocation3 + $0x1], 0  ;;  %s1376_s12 = smov 0   ;;  %s1378_s13 = smov 0  }
   0x2   :  { %s1380_s14 = smov 0   ;;  %s1382_s15 = smov 0  }
   0x3 LB: > { %s1397_s16 = sadd.s32 4294967295, %s1352_s15   ;;  %s901_s17 = sadd.s32 4294967294, %s1352_s15   ;;  %s1352_s15 = sphi %s1382_s15, %s1684_s15   ;;  %s1348_s14 = sphi %s1380_s14, %s1683_s14   ;;  %s1344_s13 = sphi %s1378_s13, %s1682_s13   ;;  %s1340_s12 = sphi %s1376_s12, %s1681_s12  }
   0x4   : > { %s1401_s18 = sadd.s32 1, %s1352_s15   ;;  %s91_s19 = sadd.s32 1, %s1348_s14 }
   0x5   : > { %s88_s20 = ssub.s32 %s1352_s15, %s1401_s18  ;;  %p101_p0 = scmp.ne.s32.totalorder %s1348_s14, %s1344_s13 }
   0x6   : > { %p89_p1 = scmp.eq.s32.totalorder %s88_s20, 0  ;;  %p102_p2 = scmp.eq.s32.totalorder %s1397_s16, 7 }
   0x7   : > { %p107_p3 = scmp.ne.s32.totalorder %s1344_s13, %s1340_s12  ;;  %p108_p4 = scmp.eq.s32.totalorder %s901_s17, 7 }
   0x8   : > { %s1412_s21 = scalar_select %p89_p1, %s1348_s14, %s91_s19  }
   0x9   : > { %p1414_p5 = por %p102_p2, %p101_p0  ;;  %p1418_p6 = por %p108_p4, %p107_p3 }
   0xa   : > { %p904_p7 = scmp.ge.s32.totalorder %s1352_s15, 1  ;;  %p142_p8 = scmp.lt.s32.totalorder %s1352_s15, 9 }
   0xc   : > { %p143_p9 = pnand %p904_p7, %p142_p8 }
   0xd   : > { %s906_s28 = sshll.u32 (!%p143_p9), %s1397_s16, 5  ;;  %s164_s8 = sand.u32 (!%p143_p9), 1, %s1344_s13  }
   0xe   : > { %146 = sbr.rel (%p143_p9) target bundleno = 318 (0x13e), region = 32  ;;  %p168_p10 = scmp.lt.s32.totalorder (!%p143_p9), %s906_s28, 255 }
   0xf   : > { %s1141_s11 = sshll.u32 (!%p143_p9), %s1397_s16, 7  ;;  %s824_s25 = scalar_lea.sflag (!%p143_p9), [#allocation3], %s164_s8 }
  0x10   : > { %s835_s20 = scalar_lea.hbm (!%p143_p9), %s1678_s3, %s1141_s11  ;;  %s1310_s30 = scalar_lea.hbm (!%p143_p9), %s1678_s3, 1024 }
  0x11   : > { %s838_s24 = sshll.u32 (!%p143_p9), %s835_s20, 4  ;;  %s839_s24 = int_to_ptr.hbm [resolvable:$true] %s838_s24 }
  0x12   : > { %s1304_s26 = sshra.s32 (!%p143_p9), %s839_s24, 4  ;;  %s1305_s26 = int_to_ptr.hbm [resolvable:$true] %s1304_s26 }
  0x13   : > { %v1138_v0 = vld [vmem:[%s1676_s1 + $0x38] sm:$0xff]  ;;  %v1140_v1 = vld [vmem:[%s1676_s1 + $0x48] sm:$0xff]  ;;  %v1137_v2 = vld [vmem:[%s1676_s1 + $0x30] sm:$0xff]  ;;  %s1686_s28 = smov (!%p168_p10, %s906_s28), 255  ;;  %vm432_vm0 = vcmask 261120   ;;  %s1306_s27 = scalar_lea.hbm %s1305_s26, 128 }
  0x14   : > { %481 = vmatpush.bf16.msra.mxu0 %v1138_v0  ;;  %1237 = vmatpush.bf16.msra.mxu2 %v1138_v0  ;;  %v1139_v3 = vld [vmem:[%s1676_s1 + $0x40] sm:$0xff]  ;;  %s1098_s6 = sshll.u32 %s1686_s28, 3  ;;  %v1136_v4 = vld [vmem:[%s1676_s1 + $0x28] sm:$0xff]  ;;  %v1134_v12 = vld [vmem:[%s1676_s1 + $0x18] sm:$0xff]  ;;  %p1307_p11 = scmp.ne.s32.totalorder %s1305_s26, %s1306_s27 }
  0x15   : > { %576 = vmatpush.bf16.msra.mxu1 %v1140_v1  ;;  %1245 = vmatpush.bf16.msra.mxu3 %v1140_v1  ;;  %s1440_s9 = scalar_lea.vmem %s1675_s0, %s1098_s6  ;;  %v1135_v8 = vld [vmem:[%s1676_s1 + $0x20] sm:$0xff]  ;;  %v1133_v13 = vld [vmem:[%s1676_s1 + $0x10] sm:$0xff]  ;;  %v1132_v17 = vld [vmem:[%s1676_s1 + $0x8] sm:$0xff]  ;;  %p1311_p0 = scmp.lt.s32.totalorder %s1305_s26, %s1678_s3 }
  0x16   : > { %v1099_v5 = vld [vmem:[%s1440_s9 + $0x4] sm:$0xf]  ;;  %v913_v6 = vld [vmem:[%s1440_s9 + $0x8] sm:$0xf0]  ;;  %v1117_v9 = vld [vmem:[%s1440_s9 + $0x94] sm:$0xf]  ;;  %p1308_p12 = pnand %p1307_p11, %p1414_p5  ;;  %p1312_p1 = scmp.lt.s32.totalorder %s1310_s30, %s1306_s27 }
  0x17   : > { %v916_v7 = vor.u32 %v1099_v5, %v913_v6  ;;  %v985_v10 = vld [vmem:[%s1440_s9 + $0x98] sm:$0xf0]  ;;  %v1101_v14 = vld [vmem:[%s1440_s9 + $0x14] sm:$0xf]  ;;  %v1119_v18 = vld [vmem:[%s1440_s9 + $0xa4] sm:$0xf] }
  0x18   : > { %482 = vmatpush.bf16.msra.mxu0 %v1137_v2  ;;  %1238 = vmatpush.bf16.msra.mxu2 %v1137_v2  ;;  %v988_v11 = vor.u32 %v1117_v9, %v985_v10  ;;  %v921_v15 = vld [vmem:[%s1440_s9 + $0x18] sm:$0xf0]  ;;  %v993_v19 = vld [vmem:[%s1440_s9 + $0xa8] sm:$0xf0]  ;;  %v1131_v21 = vld [vmem:[%s1676_s1] sm:$0xff]  ;;  %p1309_p13 = pneg %p1308_p12  ;;  %p1313_p2 = por %p1312_p1, %p1311_p0 }
  0x19   : > { %577 = vmatpush.bf16.msra.mxu1 %v1139_v3  ;;  %1246 = vmatpush.bf16.msra.mxu3 %v1139_v3  ;;  %v924_v16 = vor.u32 %v1101_v14, %v921_v15  ;;  %v996_v20 = vor.u32 %v1119_v18, %v993_v19  ;;  %v911_v22 = vld [vmem:[%s1440_s9] sm:$0xf]  ;;  %v1100_v23 = vld [vmem:[%s1440_s9 + $0x4] sm:$0xf0]  ;;  %v1103_v28 = vld [vmem:[%s1440_s9 + $0x24] sm:$0xf] }
  0x1a   : > { %v975_v24 = vld [vmem:[%s1440_s9 + $0x80] sm:$0xf]  ;;  %v1116_v25 = vld [vmem:[%s1440_s9 + $0x84] sm:$0xf0]  ;;  %v912_v26 = vor.u32 %v1100_v23, %v911_v22  ;;  %v929_v29 = vld [vmem:[%s1440_s9 + $0x28] sm:$0xf0]  ;;  %p1314_p3 = pnand %p1313_p2, %p1309_p13 }
  0x1b   : > { %v976_v27 = vor.u32 %v1116_v25, %v975_v24  ;;  %v932_v30 = vor.u32 %v1103_v28, %v929_v29  ;;  %v1121_v31 = vld [vmem:[%s1440_s9 + $0xb4] sm:$0xf]  ;;  %v1001_v32 = vld [vmem:[%s1440_s9 + $0xb8] sm:$0xf0]  ;;  %v919_v34 = vld [vmem:[%s1440_s9 + $0x10] sm:$0xf] }
  0x1c   : > { %1077 = vmatmul.msk.bf16.vlgmr.msra.gmra.mxu1 %vm432_vm0, %v916_v7  ;;  %483 = vmatpush.bf16.msra.mxu0 %v1136_v4  ;;  %v1004_v33 = vor.u32 %v1121_v31, %v1001_v32  ;;  %v1102_v35 = vld [vmem:[%s1440_s9 + $0x14] sm:$0xf0]  ;;  %v983_v36 = vld [vmem:[%s1440_s9 + $0x90] sm:$0xf]  ;;  %v1105_v40 = vld [vmem:[%s1440_s9 + $0x34] sm:$0xf] }
  0x1d   : > { %1239 = vmatpush.bf16.msra.mxu2 %v1136_v4  ;;  %1086 = vmatmul.msk.bf16.vlgmr.msra.gmra.mxu3 %vm432_vm0, %v988_v11  ;;  %v1118_v37 = vld [vmem:[%s1440_s9 + $0x94] sm:$0xf0]  ;;  %v920_v38 = vor.u32 %v1102_v35, %v919_v34  ;;  %v937_v41 = vld [vmem:[%s1440_s9 + $0x38] sm:$0xf0]  ;;  %v1123_v43 = vld [vmem:[%s1440_s9 + $0xc4] sm:$0xf] }
  0x1e   : > { %v984_v39 = vor.u32 %v1118_v37, %v983_v36  ;;  %v940_v42 = vor.u32 %v1105_v40, %v937_v41  ;;  %v1009_v44 = vld [vmem:[%s1440_s9 + $0xc8] sm:$0xf0]  ;;  %v927_v46 = vld [vmem:[%s1440_s9 + $0x20] sm:$0xf]  ;;  %v1104_v47 = vld [vmem:[%s1440_s9 + $0x24] sm:$0xf0] }
  0x1f   : > { %v1012_v45 = vor.u32 %v1123_v43, %v1009_v44  ;;  %v991_v48 = vld [vmem:[%s1440_s9 + $0xa0] sm:$0xf]  ;;  %v1120_v49 = vld [vmem:[%s1440_s9 + $0xa4] sm:$0xf0]  ;;  %v928_v50 = vor.u32 %v1104_v47, %v927_v46  ;;  %v1107_v52 = vld [vmem:[%s1440_s9 + $0x44] sm:$0xf] }
  0x20   : > { %484 = vmatpush.bf16.msra.mxu0 %v1135_v8  ;;  %v992_v51 = vor.u32 %v1120_v49, %v991_v48  ;;  %v945_v53 = vld [vmem:[%s1440_s9 + $0x48] sm:$0xf0]  ;;  %v1125_v55 = vld [vmem:[%s1440_s9 + $0xd4] sm:$0xf]  ;;  %v1017_v56 = vld [vmem:[%s1440_s9 + $0xd8] sm:$0xf0] }
  0x21   : > { %1240 = vmatpush.bf16.msra.mxu2 %v1135_v8  ;;  %v948_v54 = vor.u32 %v1107_v52, %v945_v53  ;;  %v1020_v57 = vor.u32 %v1125_v55, %v1017_v56  ;;  %v935_v58 = vld [vmem:[%s1440_s9 + $0x30] sm:$0xf]  ;;  %v1106_v59 = vld [vmem:[%s1440_s9 + $0x34] sm:$0xf0]  ;;  %v1109_v0 = vld [vmem:[%s1440_s9 + $0x54] sm:$0xf] }
  0x22   : > { %v999_v60 = vld [vmem:[%s1440_s9 + $0xb0] sm:$0xf]  ;;  %v1122_v61 = vld [vmem:[%s1440_s9 + $0xb4] sm:$0xf0]  ;;  %v936_v62 = vor.u32 %v1106_v59, %v935_v58  ;;  %v953_v1 = vld [vmem:[%s1440_s9 + $0x58] sm:$0xf0] }
  0x23   : > { %v1000_v63 = vor.u32 %v1122_v61, %v999_v60  ;;  %v956_v2 = vor.u32 %v1109_v0, %v953_v1  ;;  %v1127_v3 = vld [vmem:[%s1440_s9 + $0xe4] sm:$0xf]  ;;  %v1025_v4 = vld [vmem:[%s1440_s9 + $0xe8] sm:$0xf0]  ;;  %v943_v6 = vld [vmem:[%s1440_s9 + $0x40] sm:$0xf] }
  0x24   : > { %485 = vmatpush.bf16.msra.mxu0 %v1134_v12  ;;  %v1028_v5 = vor.u32 %v1127_v3, %v1025_v4  ;;  %v1108_v7 = vld [vmem:[%s1440_s9 + $0x44] sm:$0xf0]  ;;  %v1007_v8 = vld [vmem:[%s1440_s9 + $0xc0] sm:$0xf]  ;;  %v1129_v15 = vld [vmem:[%s1440_s9 + $0xf4] sm:$0xf] }
  0x25   : > { %1241 = vmatpush.bf16.msra.mxu2 %v1134_v12  ;;  %v1124_v9 = vld [vmem:[%s1440_s9 + $0xc4] sm:$0xf0]  ;;  %v944_v10 = vor.u32 %v1108_v7, %v943_v6  ;;  %v1111_v12 = vld [vmem:[%s1440_s9 + $0x64] sm:$0xf]  ;;  %v951_v18 = vld [vmem:[%s1440_s9 + $0x50] sm:$0xf] }
  0x26   : > { %v1008_v11 = vor.u32 %v1124_v9, %v1007_v8  ;;  %v1110_v19 = vld [vmem:[%s1440_s9 + $0x54] sm:$0xf0]  ;;  %v1113_v24 = vld [vmem:[%s1440_s9 + $0x74] sm:$0xf]  ;;  %v969_v25 = vld [vmem:[%s1440_s9 + $0x78] sm:$0xf0] }
  0x27   : > { %v952_v22 = vor.u32 %v1110_v19, %v951_v18  ;;  %v1112_v28 = vld [vmem:[%s1440_s9 + $0x64] sm:$0xf0]  ;;  %v1023_v29 = vld [vmem:[%s1440_s9 + $0xe0] sm:$0xf]  ;;  %v977_v34 = vld [vmem:[%s1440_s9 + $0x88] sm:$0xf0] }
  0x28   : > { %486 = vmatpush.bf16.msra.mxu0 %v1133_v13  ;;  %v967_v37 = vld [vmem:[%s1440_s9 + $0x70] sm:$0xf]  ;;  %v1130_v40 = vld [vmem:[%s1440_s9 + $0xf4] sm:$0xf0]  ;;  %v1543_v49 = vld [vmem:[%s1677_s2] ss:$0 sm:$0xff] }
  0x29   : > { %1242 = vmatpush.bf16.msra.mxu2 %v1133_v13  ;;  %v961_v13 = vld [vmem:[%s1440_s9 + $0x68] sm:$0xf0] }
  0x2a   : > { %v964_v14 = vor.u32 %v1111_v12, %v961_v13 }
  0x2c   : > { %1078 = vmatmul.msk.bf16.gmra.mxu1 %vm432_vm0, %v924_v16  ;;  %487 = vmatpush.bf16.msra.mxu0 %v1132_v17  ;;  %v1033_v16 = vld [vmem:[%s1440_s9 + $0xf8] sm:$0xf0] }
  0x2d   : > { %1243 = vmatpush.bf16.msra.mxu2 %v1132_v17  ;;  %1087 = vmatmul.msk.bf16.gmra.mxu3 %vm432_vm0, %v996_v20  ;;  %v1036_v17 = vor.u32 %v1129_v15, %v1033_v16  ;;  %v1015_v20 = vld [vmem:[%s1440_s9 + $0xd0] sm:$0xf] }
  0x30   : > { %488 = vmatpush.bf16.msra.mxu0 %v1131_v21 }
  0x31   : > { %1244 = vmatpush.bf16.msra.mxu2 %v1131_v21  ;;  %v1126_v21 = vld [vmem:[%s1440_s9 + $0xd4] sm:$0xf0] }
  0x32   : > { %v1016_v23 = vor.u32 %v1126_v21, %v1015_v20 }
  0x33   : > { %489 = vmatmul.bf16.vlgmr.msra.gmra.mxu0 %v912_v26  ;;  %v972_v26 = vor.u32 %v1113_v24, %v969_v25 }
  0x34   : > { %529 = vmatmul.bf16.vlgmr.msra.gmra.mxu2 %v976_v27  ;;  %v959_v27 = vld [vmem:[%s1440_s9 + $0x60] sm:$0xf] }
  0x35   : > { %v960_v31 = vor.u32 %v1112_v28, %v959_v27 }
  0x3c   : > { %1079 = vmatmul.msk.bf16.gmra.mxu1 %vm432_vm0, %v932_v30  ;;  %v1128_v30 = vld [vmem:[%s1440_s9 + $0xe4] sm:$0xf0] }
  0x3d   : > { %1088 = vmatmul.msk.bf16.gmra.mxu3 %vm432_vm0, %v1004_v33  ;;  %v1024_v32 = vor.u32 %v1128_v30, %v1023_v29  ;;  %v1115_v33 = vld [vmem:[%s1440_s9 + $0x84] sm:$0xf] }
  0x3e   : > { %v980_v35 = vor.u32 %v1115_v33, %v977_v34 }
  0x43   : > { %494 = vmatmul.bf16.gmra.mxu0 %v920_v38  ;;  %v1114_v38 = vld [vmem:[%s1440_s9 + $0x74] sm:$0xf0] }
  0x44   : > { %534 = vmatmul.bf16.gmra.mxu2 %v984_v39  ;;  %v1031_v39 = vld [vmem:[%s1440_s9 + $0xf0] sm:$0xf]  ;;  %v968_v41 = vor.u32 %v1114_v38, %v967_v37  ;;  %s905_s9 = sshll.u32 %s164_s8, 7 }
  0x45   : > { %s1561_s10 = scalar_lea.vmem [#allocation2], %s905_s9 }
  0x46   : > { %s836_s16 = sshll.u32 %s1561_s10, 4  ;;  %s837_s16 = int_to_ptr.vmem [resolvable:$true] %s836_s16 }
  0x4c   : > { %1080 = vmatmul.msk.bf16.gmra.mxu1 %vm432_vm0, %v940_v42  ;;  %v1032_v42 = vor.u32 %v1130_v40, %v1031_v39 }
  0x4d   : > { %1089 = vmatmul.msk.bf16.gmra.mxu3 %vm432_vm0, %v1012_v45 }
  0x53   : > { %499 = vmatmul.bf16.gmra.mxu0 %v928_v50 }
  0x54   : > { %539 = vmatmul.bf16.gmra.mxu2 %v992_v51  ;;  %v1549_v51 = vld [vmem:[%s1677_s2 + $0x1] ss:$0 sm:$0xff] }
  0x5c   : > { %1081 = vmatmul.msk.bf16.gmra.mxu1 %vm432_vm0, %v948_v54 }
  0x5d   : > { %1090 = vmatmul.msk.bf16.gmra.mxu3 %vm432_vm0, %v1020_v57 }
  0x63   : > { %504 = vmatmul.bf16.gmra.mxu0 %v936_v62 }
  0x64   : > { %544 = vmatmul.bf16.gmra.mxu2 %v1000_v63 }
  0x6c   : > { %1082 = vmatmul.msk.bf16.gmra.mxu1 %vm432_vm0, %v956_v2 }
  0x6d   : > { %1091 = vmatmul.msk.bf16.gmra.mxu3 %vm432_vm0, %v1028_v5 }
  0x73   : > { %509 = vmatmul.bf16.gmra.mxu0 %v944_v10 }
  0x74   : > { %549 = vmatmul.bf16.gmra.mxu2 %v1008_v11 }
  0x7c   : > { %1083 = vmatmul.msk.bf16.gmra.mxu1 %vm432_vm0, %v964_v14 }
  0x7d   : > { %1092 = vmatmul.msk.bf16.gmra.mxu3 %vm432_vm0, %v1036_v17 }
  0x83   : > { %514 = vmatmul.bf16.gmra.mxu0 %v952_v22 }
  0x84   : > { %554 = vmatmul.bf16.gmra.mxu2 %v1016_v23 }
  0x8c   : > { %1084 = vmatmul.msk.bf16.gmra.mxu1 %vm432_vm0, %v972_v26 }
  0x93   : > { %519 = vmatmul.bf16.gmra.mxu0 %v960_v31 }
  0x94   : > { %559 = vmatmul.bf16.gmra.mxu2 %v1024_v32 }
  0x99   : > { %v579_v36 = vpop.f32.mrf.mxu1 }
  0x9c   : > { %1085 = vmatmul.msk.bf16.gmra.mxu1 %vm432_vm0, %v980_v35 }
  0xa0   : > { %v624_v45 = vpop.f32.mrf.mxu3 }
  0xa1   : > { %v581_v43 = vpop.f32.mrf.mxu1 }
  0xa3   : > { %524 = vmatmul.bf16.gmra.mxu0 %v968_v41 }
  0xa4   : > { %564 = vmatmul.bf16.gmra.mxu2 %v1032_v42 }
  0xa8   : > { %v626_v53 = vpop.f32.mrf.mxu3 }
  0xa9   : > { %v584_v44 = vpop.f32.mrf.mxu1 }
  0xb0   : > { %v490_v46 = vpop.f32.mrf.mxu0  ;;  %v629_v2 = vpop.f32.mrf.mxu3 }
  0xb1   : > { %v586_v47 = vpop.f32.mrf.mxu1  ;;  %v580_v48 = vadd.f32 %v579_v36, %v490_v46 }
  0xb3   : > { %v661_v50 = vmul.f32 %v1543_v49, %v580_v48 }
  0xb5   : > { %v695_v57 = vadd.f32 %v1549_v51, %v661_v50 }
  0xb7   : > { %v1551_v52 = vpop.f32.mrf.mxu2  ;;  %v727_v60 = vmax.f32 %v695_v57, 0.0 }
  0xb8   : > { %v492_v54 = vpop.f32.mrf.mxu0  ;;  %v631_v12 = vpop.f32.mrf.mxu3 }
  0xb9   : > { %v582_v55 = vadd.f32 %v581_v43, %v492_v54  ;;  %v589_v56 = vpop.f32.mrf.mxu1 }
  0xbb   : > { %v662_v58 = vmul.f32 %v1543_v49, %v582_v55 }
  0xbd   : > { %v696_v59 = vadd.f32 %v1549_v51, %v662_v58 }
  0xbf   : > { %v728_v61 = vmax.f32 %v696_v59, 0.0  ;;  %v1559_v62 = vpop.f32.mrf.mxu2 }
  0xc0   : > { %v495_v63 = vpop.f32.mrf.mxu0  ;;  %v634_v26 = vpop.f32.mrf.mxu3 }
  0xc1   : > { %v1145_v0 = vpack.c.bf16 %v728_v61, %v727_v60  ;;  %v591_v1 = vpop.f32.mrf.mxu1  ;;  %v585_v3 = vadd.f32 %v584_v44, %v495_v63 }
  0xc3   : > { %1146 = vst [vmem:[%s1561_s10] sm:$0xff] %v1145_v0   ;;  %v663_v4 = vmul.f32 %v1543_v49, %v585_v3 }
  0xc5   : > { %v697_v10 = vadd.f32 %v1549_v51, %v663_v4 }
  0xc7   : > { %v535_v5 = vpop.f32.mrf.mxu2  ;;  %v729_v15 = vmax.f32 %v697_v10, 0.0 }
  0xc8   : > { %v497_v6 = vpop.f32.mrf.mxu0  ;;  %v625_v9 = vadd.f32 %v624_v45, %v535_v5  ;;  %v636_v43 = vpop.f32.mrf.mxu3 }
  0xc9   : > { %v587_v7 = vadd.f32 %v586_v47, %v497_v6  ;;  %v594_v8 = vpop.f32.mrf.mxu1 }
  0xca   : > { %v679_v14 = vmul.f32 %v1543_v49, %v625_v9 }
  0xcb   : > { %v664_v11 = vmul.f32 %v1543_v49, %v587_v7 }
  0xcc   : > { %v713_v22 = vadd.f32 %v1549_v51, %v679_v14 }
  0xcd   : > { %v698_v13 = vadd.f32 %v1549_v51, %v664_v11 }
  0xce   : > { %v745_v27 = vmax.f32 %v713_v22, 0.0 }
  0xcf   : > { %v730_v16 = vmax.f32 %v698_v13, 0.0  ;;  %v537_v17 = vpop.f32.mrf.mxu2 }
  0xd0   : > { %v627_v18 = vadd.f32 %v626_v53, %v537_v17  ;;  %v500_v19 = vpop.f32.mrf.mxu0  ;;  %v639_v0 = vpop.f32.mrf.mxu3 }
  0xd1   : > { %v1150_v20 = vpack.c.bf16 %v730_v16, %v729_v15  ;;  %v596_v21 = vpop.f32.mrf.mxu1  ;;  %v590_v24 = vadd.f32 %v589_v56, %v500_v19 }
  0xd2   : > { %v680_v23 = vmul.f32 %v1543_v49, %v627_v18 }
  0xd3   : > { %1222 = vst [vmem:[%s1561_s10 + $0x8] sm:$0xff] %v1150_v20   ;;  %v665_v29 = vmul.f32 %v1543_v49, %v590_v24 }
  0xd4   : > { %v714_v25 = vadd.f32 %v1549_v51, %v680_v23 }
  0xd5   : > { %v699_v36 = vadd.f32 %v1549_v51, %v665_v29 }
  0xd6   : > { %v746_v28 = vmax.f32 %v714_v25, 0.0 }
  0xd7   : > { %v540_v30 = vpop.f32.mrf.mxu2  ;;  %v731_v40 = vmax.f32 %v699_v36, 0.0 }
  0xd8   : > { %v1190_v31 = vpack.c.bf16 %v746_v28, %v745_v27  ;;  %v502_v32 = vpop.f32.mrf.mxu0  ;;  %v630_v35 = vadd.f32 %v629_v2, %v540_v30  ;;  %v641_v16 = vpop.f32.mrf.mxu3 }
  0xd9   : > { %v592_v33 = vadd.f32 %v591_v1, %v502_v32  ;;  %v599_v34 = vpop.f32.mrf.mxu1 }
  0xda   : > { %1230 = vst [vmem:[%s1561_s10 + $0x48] sm:$0xff] %v1190_v31   ;;  %v681_v39 = vmul.f32 %v1543_v49, %v630_v35 }
  0xdb   : > { %v666_v37 = vmul.f32 %v1543_v49, %v592_v33 }
  0xdc   : > { %v715_v48 = vadd.f32 %v1549_v51, %v681_v39 }
  0xdd   : > { %v700_v38 = vadd.f32 %v1549_v51, %v666_v37 }
  0xde   : > { %v747_v55 = vmax.f32 %v715_v48, 0.0 }
  0xdf   : > { %v732_v41 = vmax.f32 %v700_v38, 0.0  ;;  %v542_v42 = vpop.f32.mrf.mxu2 }
  0xe0   : > { %v632_v44 = vadd.f32 %v631_v12, %v542_v42  ;;  %v505_v45 = vpop.f32.mrf.mxu0  ;;  %v644_v30 = vpop.f32.mrf.mxu3 }
  0xe1   : > { %v1155_v46 = vpack.c.bf16 %v732_v41, %v731_v40  ;;  %v601_v47 = vpop.f32.mrf.mxu1  ;;  %v595_v53 = vadd.f32 %v594_v8, %v505_v45 }
  0xe2   : > { %v682_v50 = vmul.f32 %v1543_v49, %v632_v44 }
  0xe3   : > { %1223 = vst [vmem:[%s1561_s10 + $0x10] sm:$0xff] %v1155_v46   ;;  %v667_v57 = vmul.f32 %v1543_v49, %v595_v53 }
  0xe4   : > { %v716_v54 = vadd.f32 %v1549_v51, %v682_v50 }
  0xe5   : > { %v701_v2 = vadd.f32 %v1549_v51, %v667_v57 }
  0xe6   : > { %v748_v56 = vmax.f32 %v716_v54, 0.0 }
  0xe7   : > { %v545_v58 = vpop.f32.mrf.mxu2  ;;  %v733_v6 = vmax.f32 %v701_v2, 0.0 }
  0xe8   : > { %v1195_v59 = vpack.c.bf16 %v748_v56, %v747_v55  ;;  %v507_v60 = vpop.f32.mrf.mxu0  ;;  %v635_v1 = vadd.f32 %v634_v26, %v545_v58 }
  0xe9   : > { %v597_v61 = vadd.f32 %v596_v21, %v507_v60  ;;  %v604_v63 = vpop.f32.mrf.mxu1 }
  0xea   : > { %1231 = vst [vmem:[%s1561_s10 + $0x50] sm:$0xff] %v1195_v59   ;;  %v683_v5 = vmul.f32 %v1543_v49, %v635_v1 }
  0xeb   : > { %v668_v3 = vmul.f32 %v1543_v49, %v597_v61 }
  0xec   : > { %v717_v13 = vadd.f32 %v1549_v51, %v683_v5 }
  0xed   : > { %v702_v4 = vadd.f32 %v1549_v51, %v668_v3 }
  0xee   : > { %v749_v18 = vmax.f32 %v717_v13, 0.0 }
  0xef   : > { %v734_v7 = vmax.f32 %v702_v4, 0.0  ;;  %v547_v8 = vpop.f32.mrf.mxu2 }
  0xf0   : > { %v637_v9 = vadd.f32 %v636_v43, %v547_v8  ;;  %v510_v10 = vpop.f32.mrf.mxu0 }
  0xf1   : > { %v1160_v11 = vpack.c.bf16 %v734_v7, %v733_v6  ;;  %v606_v12 = vpop.f32.mrf.mxu1  ;;  %v600_v15 = vadd.f32 %v599_v34, %v510_v10 }
  0xf2   : > { %v684_v14 = vmul.f32 %v1543_v49, %v637_v9 }
  0xf3   : > { %1224 = vst [vmem:[%s1561_s10 + $0x18] sm:$0xff] %v1160_v11   ;;  %v669_v20 = vmul.f32 %v1543_v49, %v600_v15 }
  0xf4   : > { %v718_v17 = vadd.f32 %v1549_v51, %v684_v14 }
  0xf5   : > { %v703_v27 = vadd.f32 %v1549_v51, %v669_v20 }
  0xf6   : > { %v750_v19 = vmax.f32 %v718_v17, 0.0 }
  0xf7   : > { %v550_v21 = vpop.f32.mrf.mxu2  ;;  %v735_v32 = vmax.f32 %v703_v27, 0.0 }
  0xf8   : > { %v1200_v22 = vpack.c.bf16 %v750_v19, %v749_v18  ;;  %v512_v23 = vpop.f32.mrf.mxu0  ;;  %v640_v26 = vadd.f32 %v639_v0, %v550_v21 }
  0xf9   : > { %v602_v24 = vadd.f32 %v601_v47, %v512_v23  ;;  %v609_v25 = vpop.f32.mrf.mxu1  ;;  %v646_v47 = vpop.f32.mrf.mxu3 }
  0xfa   : > { %1232 = vst [vmem:[%s1561_s10 + $0x58] sm:$0xff] %v1200_v22   ;;  %v685_v31 = vmul.f32 %v1543_v49, %v640_v26 }
  0xfb   : > { %v670_v28 = vmul.f32 %v1543_v49, %v602_v24 }
  0xfc   : > { %v719_v39 = vadd.f32 %v1549_v51, %v685_v31 }
  0xfd   : > { %v704_v29 = vadd.f32 %v1549_v51, %v670_v28 }
  0xfe   : > { %v751_v43 = vmax.f32 %v719_v39, 0.0 }
  0xff   : > { %v736_v33 = vmax.f32 %v704_v29, 0.0  ;;  %v552_v34 = vpop.f32.mrf.mxu2 }
 0x100   : > { %v642_v35 = vadd.f32 %v641_v16, %v552_v34  ;;  %v515_v36 = vpop.f32.mrf.mxu0 }
 0x101   : > { %v1165_v37 = vpack.c.bf16 %v736_v33, %v735_v32  ;;  %v611_v38 = vpop.f32.mrf.mxu1  ;;  %v605_v41 = vadd.f32 %v604_v63, %v515_v36  ;;  %v649_v3 = vpop.f32.mrf.mxu3 }
 0x102   : > { %v686_v40 = vmul.f32 %v1543_v49, %v642_v35 }
 0x103   : > { %1225 = vst [vmem:[%s1561_s10 + $0x20] sm:$0xff] %v1165_v37   ;;  %v671_v45 = vmul.f32 %v1543_v49, %v605_v41 }
 0x104   : > { %v720_v42 = vadd.f32 %v1549_v51, %v686_v40 }
 0x105   : > { %v705_v56 = vadd.f32 %v1549_v51, %v671_v45 }
 0x106   : > { %v752_v44 = vmax.f32 %v720_v42, 0.0 }
 0x107   : > { %v555_v46 = vpop.f32.mrf.mxu2  ;;  %v737_v60 = vmax.f32 %v705_v56, 0.0 }
 0x108   : > { %v1205_v48 = vpack.c.bf16 %v752_v44, %v751_v43  ;;  %v517_v50 = vpop.f32.mrf.mxu0  ;;  %v645_v55 = vadd.f32 %v644_v30, %v555_v46 }
 0x109   : > { %v607_v53 = vadd.f32 %v606_v12, %v517_v50  ;;  %v614_v54 = vpop.f32.mrf.mxu1  ;;  %v651_v19 = vpop.f32.mrf.mxu3 }
 0x10a   : > { %1233 = vst [vmem:[%s1561_s10 + $0x60] sm:$0xff] %v1205_v48   ;;  %v687_v59 = vmul.f32 %v1543_v49, %v645_v55 }
 0x10b   : > { %v672_v57 = vmul.f32 %v1543_v49, %v607_v53 }
 0x10c   : > { %v721_v5 = vadd.f32 %v1549_v51, %v687_v59 }
 0x10d   : > { %v706_v58 = vadd.f32 %v1549_v51, %v672_v57 }
 0x10e   : > { %v753_v9 = vmax.f32 %v721_v5, 0.0 }
 0x10f   : > { %v738_v61 = vmax.f32 %v706_v58, 0.0  ;;  %v557_v63 = vpop.f32.mrf.mxu2 }
 0x110   : > { %v647_v0 = vadd.f32 %v646_v47, %v557_v63  ;;  %v520_v1 = vpop.f32.mrf.mxu0 }
 0x111   : > { %v1170_v2 = vpack.c.bf16 %v738_v61, %v737_v60  ;;  %v616_v4 = vpop.f32.mrf.mxu1  ;;  %v610_v7 = vadd.f32 %v609_v25, %v520_v1 }
 0x112   : > { %v688_v6 = vmul.f32 %v1543_v49, %v647_v0 }
 0x113   : > { %1226 = vst [vmem:[%s1561_s10 + $0x28] sm:$0xff] %v1170_v2   ;;  %v673_v11 = vmul.f32 %v1543_v49, %v610_v7 }
 0x114   : > { %v722_v8 = vadd.f32 %v1549_v51, %v688_v6 }
 0x115   : > { %v707_v18 = vadd.f32 %v1549_v51, %v673_v11 }
 0x116   : > { %v754_v10 = vmax.f32 %v722_v8, 0.0 }
 0x117   : > { %v560_v12 = vpop.f32.mrf.mxu2  ;;  %v739_v24 = vmax.f32 %v707_v18, 0.0 }
 0x118   : > { %v1210_v13 = vpack.c.bf16 %v754_v10, %v753_v9  ;;  %v522_v14 = vpop.f32.mrf.mxu0  ;;  %v650_v17 = vadd.f32 %v649_v3, %v560_v12 }
 0x119   : > { %v612_v15 = vadd.f32 %v611_v38, %v522_v14  ;;  %v619_v16 = vpop.f32.mrf.mxu1  ;;  %v654_v38 = vpop.f32.mrf.mxu3 }
 0x11a   : > { %1234 = vst [vmem:[%s1561_s10 + $0x68] sm:$0xff] %v1210_v13   ;;  %v620_v21 = vadd.f32 %v619_v16, %v1551_v52  ;;  %v689_v23 = vmul.f32 %v1543_v49, %v650_v17 }
 0x11b   : > { %v674_v20 = vmul.f32 %v1543_v49, %v612_v15 }
 0x11c   : > { %v677_v27 = vmul.f32 %v1543_v49, %v620_v21  ;;  %v723_v32 = vadd.f32 %v1549_v51, %v689_v23 }
 0x11d   : > { %v708_v22 = vadd.f32 %v1549_v51, %v674_v20 }
 0x11e   : > { %v711_v35 = vadd.f32 %v1549_v51, %v677_v27  ;;  %v755_v39 = vmax.f32 %v723_v32, 0.0 }
 0x11f   : > { %v740_v25 = vmax.f32 %v708_v22, 0.0  ;;  %v562_v26 = vpop.f32.mrf.mxu2 }
 0x120   : > { %v652_v28 = vadd.f32 %v651_v19, %v562_v26  ;;  %v525_v29 = vpop.f32.mrf.mxu0 }
 0x121   : > { %v1175_v30 = vpack.c.bf16 %v740_v25, %v739_v24  ;;  %v621_v31 = vpop.f32.mrf.mxu1  ;;  %v615_v52 = vadd.f32 %v614_v54, %v525_v29  ;;  %v656_v58 = vpop.f32.mrf.mxu3 }
 0x122   : > { %v690_v33 = vmul.f32 %v1543_v49, %v652_v28  ;;  %v622_v34 = vadd.f32 %v621_v31, %v1559_v62  ;;  %v743_v62 = vmax.f32 %v711_v35, 0.0 }
 0x123   : > { %1227 = vst [vmem:[%s1561_s10 + $0x30] sm:$0xff] %v1175_v30   ;;  %v675_v42 = vmul.f32 %v1543_v49, %v615_v52 }
 0x124   : > { %v724_v36 = vadd.f32 %v1549_v51, %v690_v33  ;;  %v678_v37 = vmul.f32 %v1543_v49, %v622_v34 }
 0x125   : > { %v709_v53 = vadd.f32 %v1549_v51, %v675_v42 }
 0x126   : > { %v756_v40 = vmax.f32 %v724_v36, 0.0  ;;  %v712_v41 = vadd.f32 %v1549_v51, %v678_v37 }
 0x127   : > { %v565_v43 = vpop.f32.mrf.mxu2  ;;  %v741_v57 = vmax.f32 %v709_v53, 0.0 }
 0x128   : > { %v1215_v44 = vpack.c.bf16 %v756_v40, %v755_v39  ;;  %v744_v45 = vmax.f32 %v712_v41, 0.0  ;;  %v527_v46 = vpop.f32.mrf.mxu0  ;;  %v655_v50 = vadd.f32 %v654_v38, %v565_v43 }
 0x129   : > { %v617_v47 = vadd.f32 %v616_v4, %v527_v46 }
 0x12a   : > { %1235 = vst [vmem:[%s1561_s10 + $0x70] sm:$0xff] %v1215_v44   ;;  %v1185_v48 = vpack.c.bf16 %v744_v45, %v743_v62  ;;  %v691_v56 = vmul.f32 %v1543_v49, %v655_v50 }
 0x12b   : > { %v676_v54 = vmul.f32 %v1543_v49, %v617_v47 }
 0x12c   : > { %1229 = vst [vmem:[%s1561_s10 + $0x40] sm:$0xff] %v1185_v48   ;;  %v725_v0 = vadd.f32 %v1549_v51, %v691_v56 }
 0x12d   : > { %v710_v55 = vadd.f32 %v1549_v51, %v676_v54 }
 0x12e   : > { %v757_v3 = vmax.f32 %v725_v0, 0.0 }
 0x12f   : > { %v742_v59 = vmax.f32 %v710_v55, 0.0  ;;  %v567_v60 = vpop.f32.mrf.mxu2 }
 0x130   : > { %v657_v61 = vadd.f32 %v656_v58, %v567_v60 }
 0x131   : > { %v1180_v63 = vpack.c.bf16 %v742_v59, %v741_v57 }
 0x132   : > { %v692_v1 = vmul.f32 %v1543_v49, %v657_v61 }
 0x133   : > { %1228 = vst [vmem:[%s1561_s10 + $0x38] sm:$0xff] %v1180_v63  }
 0x134   : > { %v726_v2 = vadd.f32 %v1549_v51, %v692_v1 }
 0x136   : > { %v758_v4 = vmax.f32 %v726_v2, 0.0 }
 0x138   : > { %v1220_v5 = vpack.c.bf16 %v758_v4, %v757_v3 }
 0x13a   : > { %1236 = vst [vmem:[%s1561_s10 + $0x78] sm:$0xff] %v1220_v5  }
 0x13b   : > { %1317 = shalt.err (!%p1314_p3)
}
 0x13c   : > { %s1354_s6 = smov 64   ;;  %s1355_s7 = smov 4  }
 0x13d   : > { %1247 = dma.vmem_to_hbm [thread:$0]  (%p1414_p5), %s837_s16, 2048, %s839_s24, %s824_s25, %s1354_s6, %s1354_s6, %s1355_s7  }
 0x13e PF: > { %p1253_p4 = scmp.ge.s32.totalorder %s1352_s15, 2  ;;  %s853_s8 = sand.u32 1, %s1340_s12  }
 0x13f   : > { %s854_s9 = scalar_lea.sflag [#allocation3], %s853_s8 }
 0x140   : > { %p1250_p7 = pnand %p1253_p4, %p1418_p6 }
 0x142   : > { %p1251_p8 = pneg %p1250_p7 }
 0x144   : > { %1335 = dma.done.wait (%p1251_p8), %s854_s9, 2048  }
 0x145   : > { %1337 = vsyncadd (%p1251_p8), %s854_s9, 4294965248  ;;  %p13_p9 = scmp.ge.s32.totalorder %s1401_s18, 10   ;;  %s1681_s12 = smov %s1344_s13 }
 0x146   : > { %s1682_s13 = smov %s1348_s14  ;;  %s1683_s14 = smov %s1412_s21 }
 0x147   : > { %s1684_s15 = smov %s1401_s18  ;;  %15 = sbr.rel (!%p13_p9) target bundleno = 3 (0x3), region = 67 }
 0x14c   :  { %860 = vsyncpa [#allocation3], 1 }
 0x14d   :  { %862 = vsyncpa [#allocation3 + $0x1], 1 }

</bundles_post_ra>
